<compile_context>
chip_gen: v7x
topology: tpu7x:2x2x1
jax: 0.10.0
libtpu: 0.0.40
codegen_flags: <defaults>
</compile_context>

<pallas_src>
import jax
import jax.numpy as jnp
from jax.experimental import pallas as pl
from jax.experimental.pallas import tpu as pltpu


def gnet_kernel(x1_ref, x2_ref, wa_ref, wb_ref, bias_ref, o_ref):
    x1 = x1_ref[...]                                     # (TB, 128) packed rows
    x2 = x2_ref[...]                                     # (TB, 128)
    acc = jnp.dot(x1 + x2, wa_ref[...], preferred_element_type=jnp.float32)
    acc += jnp.dot(x1 * x2, wb_ref[...], preferred_element_type=jnp.float32)
    acc += bias_ref[...]                                 # (1, 128) row broadcast
    o_ref[...] = acc.astype(o_ref.dtype)


def g_net_forward(x1, x2, wa, ba, wb, bb, *, tb=None):
    """x1, x2: (B, 32) float32. wa, wb: (32, 32) PyTorch-style (out, in).
    ba, bb: (32,). Returns (B, 32) float32."""
    B, D = x1.shape
    assert D == 32 and x2.shape == (B, D)
    LANES = 128
    P = LANES // D                                        # 4 original rows / packed row

    # Rarely-taken tiny pad (<= 3 rows) so the 128-lane reinterpret is exact.
    Bp = ((B + P - 1) // P) * P
    if Bp != B:
        pad = ((0, Bp - B), (0, 0))
        x1 = jnp.pad(x1, pad)
        x2 = jnp.pad(x2, pad)
    R = Bp // P                                           # packed (lane-dense) rows

    # Free, contiguous reinterpret: (Bp, 32) -> (R, 128).
    x1p = x1.reshape(R, LANES)
    x2p = x2.reshape(R, LANES)

    # One-time operand prep (outside the hot path):
    #   block-diagonal weights so packed rows stay independent,
    #   fused bias 2*ba + bb tiled across the 4 packed sub-rows.
    eye = jnp.eye(P, dtype=jnp.float32)
    wa_p = jnp.kron(eye, wa.T.astype(jnp.float32))        # (128, 128)
    wb_p = jnp.kron(eye, wb.T.astype(jnp.float32))        # (128, 128)
    bias_p = jnp.tile(2.0 * ba + bb, (P,)).reshape(1, LANES)

    # Tile selection: single full block for small inputs; otherwise 2048 packed
    # rows = 1 MiB/input tile (near HBM roofline, >=2 grid steps whenever it
    # matters, ~6 MiB double-buffered -> fits v5e/v6e/v7x scoped-VMEM defaults).
    if tb is None:
        tb = R if R <= 2048 else 2048

    grid = (pl.cdiv(R, tb),)                              # ragged last block OK
    row_spec = pl.BlockSpec((tb, LANES), lambda i: (i, 0))
    w_spec = pl.BlockSpec((LANES, LANES), lambda i: (0, 0))     # VMEM-resident
    b_spec = pl.BlockSpec((1, LANES), lambda i: (0, 0))         # VMEM-resident

    out_p = pl.pallas_call(
        gnet_kernel,
        out_shape=jax.ShapeDtypeStruct((R, LANES), jnp.float32),
        grid=grid,
        in_specs=[row_spec, row_spec, w_spec, w_spec, b_spec],
        out_specs=row_spec,
        compiler_params=pltpu.CompilerParams(
            dimension_semantics=("parallel",),
        ),
        cost_estimate=pl.CostEstimate(
            flops=2 * 2 * R * LANES * LANES,
            transcendentals=0,
            bytes_accessed=(3 * R * LANES + 2 * LANES * LANES + LANES) * 4,
        ),
    )(x1p, x2p, wa_p, wb_p, bias_p)

    out = out_p.reshape(Bp, D)                            # free reinterpret back
    return out[:B] if Bp != B else out


if __name__ == "__main__":
    key = jax.random.PRNGKey(0)
    k1, k2, k3, k4, k5, k6 = jax.random.split(key, 6)

    B, D = 8, 32
    # deterministic synthetic parameters (PyTorch nn.Linear(32, 32) shapes)
    bound = 1.0 / jnp.sqrt(jnp.float32(D))
    wa = jax.random.uniform(k1, (D, D), jnp.float32, -bound, bound)   # (out, in)
    ba = jax.random.uniform(k2, (D,), jnp.float32, -bound, bound)
    wb = jax.random.uniform(k3, (D, D), jnp.float32, -bound, bound)
    bb = jax.random.uniform(k4, (D,), jnp.float32, -bound, bound)

    x1 = jax.random.normal(k5, (B, D), jnp.float32)
    x2 = jax.random.normal(k6, (B, D), jnp.float32)

    out = jax.block_until_ready(g_net_forward(x1, x2, wa, ba, wb, bb))

    # pure-JAX reference for sanity
    ref = (x1 @ wa.T + ba) + (x2 @ wa.T + ba) + ((x1 * x2) @ wb.T + bb)
    assert out.shape == (B, D)
    assert jnp.allclose(out, ref, atol=1e-5, rtol=1e-5)

    print("KERNEL_OK")
</pallas_src>

<mosaic_0001>
module attributes {stable_mosaic.version = 11 : i64} {
  func.func @gnet_kernel(%arg0: i32, %arg1: memref<2x128xf32, #tpu.memory_space<vmem>>, %arg2: memref<2x128xf32, #tpu.memory_space<vmem>>, %arg3: memref<128x128xf32, #tpu.memory_space<vmem>>, %arg4: memref<128x128xf32, #tpu.memory_space<vmem>>, %arg5: memref<1x128xf32, #tpu.memory_space<vmem>>, %arg6: memref<2x128xf32, #tpu.memory_space<vmem>>) attributes {dimension_semantics = [#tpu.dimension_semantics<parallel>], iteration_bounds = array<i64: 1>, scalar_prefetch = 0 : i64, scratch_operands = 0 : i64, tpu.core_type = #tpu.core_type<tc>, window_params = [{transform_indices = @transform_0, window_bounds = array<i64: 2, 128>}, {transform_indices = @transform_1, window_bounds = array<i64: 2, 128>}, {pipeline_mode = #tpu.pipeline_mode<synchronous>, transform_indices = @transform_2, window_bounds = array<i64: 128, 128>}, {pipeline_mode = #tpu.pipeline_mode<synchronous>, transform_indices = @transform_3, window_bounds = array<i64: 128, 128>}, {pipeline_mode = #tpu.pipeline_mode<synchronous>, transform_indices = @transform_4, window_bounds = array<i64: 1, 128>}, {transform_indices = @transform_5, window_bounds = array<i64: 2, 128>}]} {
    %c0 = arith.constant 0 : index
    %c0_0 = arith.constant 0 : index
    %0 = vector.load %arg1[%c0, %c0_0] : memref<2x128xf32, #tpu.memory_space<vmem>>, vector<2x128xf32>
    %c0_1 = arith.constant 0 : index
    %c0_2 = arith.constant 0 : index
    %1 = vector.load %arg2[%c0_1, %c0_2] : memref<2x128xf32, #tpu.memory_space<vmem>>, vector<2x128xf32>
    %2 = arith.addf %0, %1 : vector<2x128xf32>
    %c0_3 = arith.constant 0 : index
    %c0_4 = arith.constant 0 : index
    %3 = vector.load %arg3[%c0_3, %c0_4] : memref<128x128xf32, #tpu.memory_space<vmem>>, vector<128x128xf32>
    %cst = arith.constant dense<0.000000e+00> : vector<2x128xf32>
    %4 = tpu.matmul %2, %3, %cst {dimension_numbers = #tpu.dot_dimension_numbers<[1], [0], [0], [1], [0, 0, 1, 1], [], []>} : vector<2x128xf32>, vector<128x128xf32>, vector<2x128xf32> -> vector<2x128xf32>
    %5 = arith.mulf %0, %1 : vector<2x128xf32>
    %c0_5 = arith.constant 0 : index
    %c0_6 = arith.constant 0 : index
    %6 = vector.load %arg4[%c0_5, %c0_6] : memref<128x128xf32, #tpu.memory_space<vmem>>, vector<128x128xf32>
    %cst_7 = arith.constant dense<0.000000e+00> : vector<2x128xf32>
    %7 = tpu.matmul %5, %6, %cst_7 {dimension_numbers = #tpu.dot_dimension_numbers<[1], [0], [0], [1], [0, 0, 1, 1], [], []>} : vector<2x128xf32>, vector<128x128xf32>, vector<2x128xf32> -> vector<2x128xf32>
    %8 = arith.addf %4, %7 : vector<2x128xf32>
    %c0_8 = arith.constant 0 : index
    %c0_9 = arith.constant 0 : index
    %9 = vector.load %arg5[%c0_8, %c0_9] : memref<1x128xf32, #tpu.memory_space<vmem>>, vector<1x128xf32>
    %10 = vector.broadcast %9 : vector<1x128xf32> to vector<2x128xf32>
    %11 = arith.addf %8, %10 : vector<2x128xf32>
    %c0_10 = arith.constant 0 : index
    %c0_11 = arith.constant 0 : index
    %12 = vector.load %arg6[%c0_10, %c0_11] : memref<2x128xf32, #tpu.memory_space<vmem>>, vector<2x128xf32>
    tpu.vector_store %arg6[%c0_10, %c0_11], %11 {strides = array<i32>} : memref<2x128xf32, #tpu.memory_space<vmem>>, vector<2x128xf32>,
    return
  }
  func.func @transform_0(%arg0: i32) -> (i32, i32) {
    %c0_i32 = arith.constant 0 : i32
    %c0_i32_0 = arith.constant 0 : i32
    return %arg0, %c0_i32 : i32, i32
  }
  func.func @transform_1(%arg0: i32) -> (i32, i32) {
    %c0_i32 = arith.constant 0 : i32
    %c0_i32_0 = arith.constant 0 : i32
    return %arg0, %c0_i32 : i32, i32
  }
  func.func @transform_2(%arg0: i32) -> (i32, i32) {
    %c0_i32 = arith.constant 0 : i32
    %c0_i32_0 = arith.constant 0 : i32
    %c0_i32_1 = arith.constant 0 : i32
    return %c0_i32, %c0_i32_0 : i32, i32
  }
  func.func @transform_3(%arg0: i32) -> (i32, i32) {
    %c0_i32 = arith.constant 0 : i32
    %c0_i32_0 = arith.constant 0 : i32
    %c0_i32_1 = arith.constant 0 : i32
    return %c0_i32, %c0_i32_0 : i32, i32
  }
  func.func @transform_4(%arg0: i32) -> (i32, i32) {
    %c0_i32 = arith.constant 0 : i32
    %c0_i32_0 = arith.constant 0 : i32
    %c0_i32_1 = arith.constant 0 : i32
    return %c0_i32, %c0_i32_0 : i32, i32
  }
  func.func @transform_5(%arg0: i32) -> (i32, i32) {
    %c0_i32 = arith.constant 0 : i32
    %c0_i32_0 = arith.constant 0 : i32
    return %arg0, %c0_i32 : i32, i32
  }
}

</mosaic_0001>

<bundles_post_ra>
// kernel: tpu_custom_call.1
= control target key start
LH: loop header
LB: loop body
LE: loop exit
PB: predicated region body
PF: predicated region fallthrough
CT: control target
= control target key end

     0   :  { %10 = vsyncpa [#allocation3], 0  ;;  %s632_s0 = inlined_call_operand.hbm [shape: f32[2,128], index: 0, kind: input, shape index: {}]   ;;  %s633_s1 = inlined_call_operand.vmem [shape: f32[2,128], index: 1, kind: input, shape index: {}]   ;;  %s634_s2 = inlined_call_operand.hbm [shape: f32[128,128], index: 2, kind: input, shape index: {}]   ;;  %s635_s3 = inlined_call_operand.hbm [shape: f32[128,128], index: 3, kind: input, shape index: {}]   ;;  %s636_s4 = inlined_call_operand.vmem [shape: f32[1,128], index: 4, kind: input, shape index: {}]   ;;  %s637_s5 = inlined_call_operand.hbm [shape: f32[2,128], index: 5, kind: output, shape index: {}]  }
   0x1   :  { %11 = vsyncpa [#allocation6], 0 }
   0x2   :  { %12 = vsyncpa [#allocation4], 0  ;;  %s517_s18 = smov [#allocation5]   ;;  %s423_s22 = scalar_lea.hbm %s634_s2, 2048 }
   0x3   :  { %s30_s19 = sshll.u32 %s517_s18, 4  ;;  %p424_p0 = scmp.ne.s32.totalorder %s634_s2, %s423_s22  ;;  %s31_s19 = int_to_ptr.vmem [resolvable:$true] %s30_s19 }
   0x4   :  { %p427_p1 = scmp.lt.u32.totalorder %s423_s22, %s634_s2 }
   0x6   :  { %p429_p2 = pnand %p427_p1, %p424_p0 }
   0x8   :  { %432 = shalt.err (!%p429_p2)
}
   0x9   :  { %s433_s27 = scalar_lea.vmem %s31_s19, 2048  ;;  %p438_p4 = scmp.lt.s32.totalorder %s31_s19, %s31_s19 }
   0xa   :  { %p434_p3 = scmp.ne.s32.totalorder %s31_s19, %s433_s27  ;;  %p439_p5 = scmp.lt.s32.totalorder %s433_s27, %s433_s27 }
   0xc   :  { %p440_p6 = por %p439_p5, %p438_p4 }
   0xe   :  { %p441_p7 = pnand %p440_p6, %p434_p3 }
  0x10   :  { %444 = shalt.err (!%p441_p7)
}
  0x11   :  { %s518_s28 = smov 128   ;;  %s519_s29 = smov 8  }
  0x12   :  { %36 = dma.hbm_to_vmem [thread:$0]  %s634_s2, 2048, %s31_s19, [#allocation6], %s518_s28, %s518_s28, %s519_s29  }
  0x13   :  { %s520_s7 = smov [#allocation2]   ;;  %s521_s9 = smov [#allocation7]  }
  0x14   :  { %s19_s8 = sshll.u32 %s520_s7, 4  ;;  %s42_s10 = sshll.u32 %s521_s9, 4  ;;  %s20_s8 = int_to_ptr.vmem [resolvable:$true] %s19_s8  ;;  %s43_s10 = int_to_ptr.vmem [resolvable:$true] %s42_s10 }
  0x15   :  { %s445_s13 = scalar_lea.hbm %s632_s0, 32 }
  0x16   :  { %p446_p8 = scmp.ne.s32.totalorder %s632_s0, %s445_s13  ;;  %p449_p9 = scmp.lt.u32.totalorder %s445_s13, %s632_s0 }
  0x18   :  { %p451_p10 = pnand %p449_p9, %p446_p8 }
  0x1a   :  { %454 = shalt.err (!%p451_p10)
}
  0x1b   :  { %s455_s2 = scalar_lea.vmem %s20_s8, 32  ;;  %p460_p12 = scmp.lt.s32.totalorder %s20_s8, %s20_s8 }
  0x1c   :  { %p456_p11 = scmp.ne.s32.totalorder %s20_s8, %s455_s2  ;;  %p461_p13 = scmp.lt.s32.totalorder %s455_s2, %s455_s2 }
  0x1e   :  { %p462_p0 = por %p461_p13, %p460_p12 }
  0x20   :  { %p463_p1 = pnand %p462_p0, %p456_p11 }
  0x22   :  { %466 = shalt.err (!%p463_p1)
}
  0x23   :  { %22 = dma.hbm_to_vmem [thread:$0]  %s632_s0, 32, %s20_s8, [#allocation3]  }
  0x24   :  { %s467_s22 = scalar_lea.hbm %s635_s3, 2048 }
  0x25   :  { %p468_p2 = scmp.ne.s32.totalorder %s635_s3, %s467_s22  ;;  %p471_p3 = scmp.lt.u32.totalorder %s467_s22, %s635_s3 }
  0x27   :  { %p473_p4 = pnand %p471_p3, %p468_p2 }
  0x29   :  { %476 = shalt.err (!%p473_p4)
}
  0x2a   :  { %s477_s27 = scalar_lea.vmem %s43_s10, 2048  ;;  %p482_p6 = scmp.lt.s32.totalorder %s43_s10, %s43_s10 }
  0x2b   :  { %p478_p5 = scmp.ne.s32.totalorder %s43_s10, %s477_s27  ;;  %p483_p7 = scmp.lt.s32.totalorder %s477_s27, %s477_s27 }
  0x2d   :  { %p484_p8 = por %p483_p7, %p482_p6 }
  0x2f   :  { %p485_p9 = pnand %p484_p8, %p478_p5 }
  0x31   :  { %488 = shalt.err (!%p485_p9)
}
  0x32   :  { %48 = dma.hbm_to_vmem [thread:$0]  %s635_s3, 2048, %s43_s10, [#allocation6], %s518_s28, %s518_s28, %s519_s29  }
  0x33   :  { %511 = dma.done.wait [#allocation3], 32  }
  0x34   :  { %512 = vsyncadd [#allocation3], 4294967264 }
  0x35   :  { %513 = dma.done.wait [#allocation6], 4096  }
  0x36   :  { %514 = vsyncadd [#allocation6], 4294963200  ;;  %v522_v0 = vmov 0.0|0.0   ;;  %vm523_vm0 = vmmov 0   ;;  %v524_v1 = vmov 0.0   ;;  %v80_v2 = vld [vmem:[#allocation7] sm:$0xff] }
  0x37   :  { %366 = vmatprep.subr.bf16.mxu0 %v522_v0  ;;  %390 = vmatprep.subr.bf16.mxu1 %v522_v0  ;;  %v81_v3 = vld [vmem:[#allocation7 + $0x8] sm:$0xff]  ;;  %v63_v4 = vld [vmem:[#allocation5] sm:$0xff]  ;;  %v82_v7 = vld [vmem:[#allocation7 + $0x10] sm:$0xff] }
  0x38   :  { %328 = vmatprep.mubr.msk.f32.mxu0 %vm523_vm0, %v524_v1  ;;  %363 = vmatprep.mubr.msk.f32.mxu1 %vm523_vm0, %v524_v1  ;;  %v367_v5 = vpack.c.bf16 %v81_v3, %v80_v2  ;;  %v64_v6 = vld [vmem:[#allocation5 + $0x8] sm:$0xff]  ;;  %v83_v8 = vld [vmem:[#allocation7 + $0x18] sm:$0xff]  ;;  %v65_v10 = vld [vmem:[#allocation5 + $0x10] sm:$0xff] }
  0x39   :  { %v391_v9 = vpack.c.bf16 %v64_v6, %v63_v4  ;;  %v66_v11 = vld [vmem:[#allocation5 + $0x18] sm:$0xff]  ;;  %v370_v12 = vpack.c.bf16 %v83_v8, %v82_v7  ;;  %v84_v14 = vld [vmem:[#allocation7 + $0x20] sm:$0xff]  ;;  %v85_v15 = vld [vmem:[#allocation7 + $0x28] sm:$0xff] }
  0x3a   :  { %368 = vmatpush3.bf16.msra.mxu0 %v367_v5  ;;  %v394_v13 = vpack.c.bf16 %v66_v11, %v65_v10  ;;  %v67_v16 = vld [vmem:[#allocation5 + $0x20] sm:$0xff]  ;;  %v68_v17 = vld [vmem:[#allocation5 + $0x28] sm:$0xff]  ;;  %v373_v18 = vpack.c.bf16 %v85_v15, %v84_v14  ;;  %v86_v20 = vld [vmem:[#allocation7 + $0x30] sm:$0xff] }
  0x3b   :  { %392 = vmatpush3.bf16.msra.mxu1 %v391_v9  ;;  %369 = vmatprep.subr.bf16.mxu0 %v522_v0  ;;  %v397_v19 = vpack.c.bf16 %v68_v17, %v67_v16  ;;  %v87_v21 = vld [vmem:[#allocation7 + $0x38] sm:$0xff]  ;;  %v69_v22 = vld [vmem:[#allocation5 + $0x30] sm:$0xff]  ;;  %v88_v26 = vld [vmem:[#allocation7 + $0x40] sm:$0xff] }
  0x3c   :  { %393 = vmatprep.subr.bf16.mxu1 %v522_v0  ;;  %v70_v23 = vld [vmem:[#allocation5 + $0x38] sm:$0xff]  ;;  %v376_v24 = vpack.c.bf16 %v87_v21, %v86_v20  ;;  %v89_v27 = vld [vmem:[#allocation7 + $0x48] sm:$0xff]  ;;  %v71_v28 = vld [vmem:[#allocation5 + $0x40] sm:$0xff] }
  0x3d   :  { %v400_v25 = vpack.c.bf16 %v70_v23, %v69_v22  ;;  %v72_v29 = vld [vmem:[#allocation5 + $0x48] sm:$0xff]  ;;  %v379_v30 = vpack.c.bf16 %v89_v27, %v88_v26  ;;  %v90_v32 = vld [vmem:[#allocation7 + $0x50] sm:$0xff]  ;;  %v91_v33 = vld [vmem:[#allocation7 + $0x58] sm:$0xff] }
  0x3e   :  { %371 = vmatpush3.bf16.msra.mxu0 %v370_v12  ;;  %v403_v31 = vpack.c.bf16 %v72_v29, %v71_v28  ;;  %v73_v34 = vld [vmem:[#allocation5 + $0x50] sm:$0xff]  ;;  %v74_v35 = vld [vmem:[#allocation5 + $0x58] sm:$0xff]  ;;  %v382_v36 = vpack.c.bf16 %v91_v33, %v90_v32  ;;  %v92_v38 = vld [vmem:[#allocation7 + $0x60] sm:$0xff] }
  0x3f   :  { %395 = vmatpush3.bf16.msra.mxu1 %v394_v13  ;;  %372 = vmatprep.subr.bf16.mxu0 %v522_v0  ;;  %v406_v37 = vpack.c.bf16 %v74_v35, %v73_v34  ;;  %v93_v39 = vld [vmem:[#allocation7 + $0x68] sm:$0xff]  ;;  %v75_v40 = vld [vmem:[#allocation5 + $0x60] sm:$0xff]  ;;  %v94_v44 = vld [vmem:[#allocation7 + $0x70] sm:$0xff] }
  0x40   :  { %396 = vmatprep.subr.bf16.mxu1 %v522_v0  ;;  %v76_v41 = vld [vmem:[#allocation5 + $0x68] sm:$0xff]  ;;  %v385_v42 = vpack.c.bf16 %v93_v39, %v92_v38  ;;  %v95_v45 = vld [vmem:[#allocation7 + $0x78] sm:$0xff]  ;;  %v77_v46 = vld [vmem:[#allocation5 + $0x70] sm:$0xff] }
  0x41   :  { %v409_v43 = vpack.c.bf16 %v76_v41, %v75_v40  ;;  %v78_v47 = vld [vmem:[#allocation5 + $0x78] sm:$0xff]  ;;  %v388_v48 = vpack.c.bf16 %v95_v45, %v94_v44 }
  0x42   :  { %374 = vmatpush3.bf16.msra.mxu0 %v373_v18  ;;  %v60_v49 = vld [vmem:[#allocation2] sm:$0x3]  ;;  %v412_v51 = vpack.c.bf16 %v78_v47, %v77_v46 }
  0x43   :  { %398 = vmatpush3.bf16.msra.mxu1 %v397_v19  ;;  %375 = vmatprep.subr.bf16.mxu0 %v522_v0  ;;  %v61_v50 = vld [vmem:[%s633_s1] sm:$0x3]  ;;  %s525_s1 = smov [#allocation8]  }
  0x44   :  { %399 = vmatprep.subr.bf16.mxu1 %v522_v0  ;;  %v79_v52 = vmul.f32 %v61_v50, %v60_v49  ;;  %v62_v53 = vadd.f32 %v61_v50, %v60_v49  ;;  %v261_v56 = vld [vmem:[%s636_s4] ss:$0 sm:$0xff]  ;;  %s251_s7 = sshll.u32 %s525_s1, 4  ;;  %s252_s7 = int_to_ptr.vmem [resolvable:$true] %s251_s7 }
  0x45   :  { %s489_s8 = scalar_lea.vmem %s252_s7, 32  ;;  %p494_p11 = scmp.lt.s32.totalorder %s252_s7, %s252_s7 }
  0x46   :  { %377 = vmatpush3.bf16.msra.mxu0 %v376_v24  ;;  %p490_p10 = scmp.ne.s32.totalorder %s252_s7, %s489_s8  ;;  %p495_p12 = scmp.lt.s32.totalorder %s489_s8, %s489_s8 }
  0x47   :  { %401 = vmatpush3.bf16.msra.mxu1 %v400_v25  ;;  %378 = vmatprep.subr.bf16.mxu0 %v522_v0 }
  0x48   :  { %402 = vmatprep.subr.bf16.mxu1 %v522_v0  ;;  %p496_p13 = por %p495_p12, %p494_p11 }
  0x4a   :  { %380 = vmatpush3.bf16.msra.mxu0 %v379_v30  ;;  %p497_p0 = pnand %p496_p13, %p490_p10 }
  0x4b   :  { %404 = vmatpush3.bf16.msra.mxu1 %v403_v31  ;;  %381 = vmatprep.subr.bf16.mxu0 %v522_v0 }
  0x4c   :  { %405 = vmatprep.subr.bf16.mxu1 %v522_v0 }
  0x4e   :  { %383 = vmatpush3.bf16.msra.mxu0 %v382_v36 }
  0x4f   :  { %407 = vmatpush3.bf16.msra.mxu1 %v406_v37  ;;  %384 = vmatprep.subr.bf16.mxu0 %v522_v0 }
  0x50   :  { %408 = vmatprep.subr.bf16.mxu1 %v522_v0 }
  0x52   :  { %386 = vmatpush3.bf16.msra.mxu0 %v385_v42 }
  0x53   :  { %410 = vmatpush3.bf16.msra.mxu1 %v409_v43  ;;  %387 = vmatprep.subr.bf16.mxu0 %v522_v0 }
  0x54   :  { %411 = vmatprep.subr.bf16.mxu1 %v522_v0 }
  0x56   :  { %389 = vmatpush3.bf16.msra.mxu0 %v388_v48 }
  0x57   :  { %413 = vmatpush3.bf16.msra.mxu1 %v412_v51 }
  0x59   :  { %329 = vmatmul.mubr.f32.vlgmr.msra.gmra.mrb[0].mxu0 %v79_v52 }
  0x5a   :  { %364 = vmatmul.mubr.f32.vlgmr.msra.gmra.mrb[0].mxu1 %v62_v53 }
 0x12c   :  { %v162_v54 = vpop.f32.mrb[0].mxu0 }
 0x12d   :  { %v232_v55 = vpop.f32.mrb[0].mxu1  ;;  %v330_v57 = vpop.f32.mrb[1].mxu0 }
 0x12e   :  { %v233_v58 = vadd.f32 %v232_v55, %v162_v54  ;;  %v365_v59 = vpop.f32.mrb[1].mxu1 }
 0x130   :  { %v243_v60 = vadd.f32 %v261_v56, %v233_v58 }
 0x132   :  { %244 = vst [vmem:[#allocation8] sm:$0x3] %v243_v60 }
 0x133   :  { %500 = shalt.err (!%p497_p0)
}
 0x134   :  { %s501_s11 = scalar_lea.hbm %s637_s5, 32 }
 0x135   :  { %p502_p1 = scmp.ne.s32.totalorder %s637_s5, %s501_s11  ;;  %p505_p2 = scmp.lt.u32.totalorder %s501_s11, %s637_s5 }
 0x137   :  { %p507_p3 = pnand %p505_p2, %p502_p1 }
 0x139   :  { %510 = shalt.err (!%p507_p3)
}
 0x13a   :  { %254 = dma.vmem_to_hbm [thread:$0]  %s252_s7, 32, %s637_s5, [#allocation4]  }
 0x13b   :  { %515 = dma.done.wait [#allocation4], 32  }
 0x13c   :  { %516 = vsyncadd [#allocation4], 4294967264 }
 0x13d   :  { %258 = vsyncpa [#allocation3], 1 }
 0x13e   :  { %259 = vsyncpa [#allocation6], 1 }
 0x13f   :  { %260 = vsyncpa [#allocation4], 1 }

</bundles_post_ra>
